<compile_context>
chip_gen: v6e
topology: v6e:2x2x1
jax: 0.10.0
libtpu: 0.0.40
codegen_flags: <defaults>
</compile_context>

<pallas_src>
import jax
import jax.numpy as jnp
from jax import lax
from jax.experimental import pallas as pl
from jax.experimental.pallas import tpu as pltpu


# ----------------------------------------------------------------------------
# Fused kernel:  relu(bn1(x)) -> 1x1 conv -> 2x2 avg pool
#   x_ref : (1, 2*TRo, Wout, 2*Cin)   rows 2r,2r+1; column pairs packed in lanes
#   s_ref : (1, 2*Cin)                folded BN scale, duplicated for the pair
#   b_ref : (1, 2*Cin)                folded BN shift, duplicated for the pair
#   w_ref : (2*Cin, Cout)             0.25 * [W1 ; W1]  (pool avg + col-sum folded in)
#   o_ref : (1, TRo, Wout, Cout)
# ----------------------------------------------------------------------------
def _transition_kernel(x_ref, s_ref, b_ref, w_ref, o_ref):
    x = x_ref[0]                                        # (2*TRo, Wout, 2*Cin)
    h = jnp.maximum(x * s_ref[...] + b_ref[...], 0.0)   # folded BN + ReLU
    tr2, wout, cin2 = h.shape
    h = h.reshape(tr2 // 2, 2, wout, cin2)              # split rows into pool pairs (free)
    hp = h[:, 0] + h[:, 1]                              # vertical pool sum  (TRo, Wout, 2*Cin)
    # Single MXU matmul: contracts 2*Cin -> does the 1x1 conv AND the
    # horizontal pool sum at once; 0.25 is already folded into w_ref.
    y = lax.dot_general(hp, w_ref[...],
                        dimension_numbers=(((2,), (0,)), ((), ())),
                        preferred_element_type=jnp.float32)
    o_ref[0] = y                                        # (TRo, Wout, Cout)


def _pick_row_tile(hout, wout, cin, cout, vmem_budget_bytes=8 << 20):
    """Output-row tile so that double-buffered in/out tiles stay well under VMEM."""
    in_row = 2 * wout * (2 * cin) * 4          # two source rows, f32
    out_row = wout * cout * 4
    per_row = 3 * in_row + 2 * out_row         # dbl-buffered input + output + temps
    tro = vmem_budget_bytes // max(1, per_row)
    return int(max(1, min(hout, tro, 512)))


def _fold_bn(gamma, beta, mean, var, eps=1e-5):
    scale = gamma / jnp.sqrt(var + eps)
    shift = beta - mean * scale
    return scale, shift


# ----------------------------------------------------------------------------
# Module wrapper (parameters + NCHW <-> NHWC glue)
# ----------------------------------------------------------------------------
def init_transition_params(key, n_channels, n_out_channels):
    ks = jax.random.split(key, 5)
    return {
        # conv1: PyTorch weight (nOut, nCh, 1, 1) -> stored (nCh, nOut)
        "w1": 0.1 * jax.random.normal(ks[0], (n_channels, n_out_channels),
                                      jnp.float32),
        # bn1 (affine + running stats)
        "g1": 1.0 + 0.1 * jax.random.normal(ks[1], (n_channels,), jnp.float32),
        "be1": 0.1 * jax.random.normal(ks[2], (n_channels,), jnp.float32),
        "m1": 0.05 * jax.random.normal(ks[3], (n_channels,), jnp.float32),
        "v1": jnp.abs(1.0 + 0.1 * jax.random.normal(ks[4], (n_channels,),
                                                    jnp.float32)),
    }


@jax.jit
def transition_forward(params, x_nchw):
    w1 = params["w1"]                                   # (Cin, Cout)
    cin, cout = w1.shape
    n, _, h, w = x_nchw.shape
    hout, wout = h // 2, w // 2                         # avg_pool2d(,2) floors
    he, we = 2 * hout, 2 * wout

    # NCHW -> NHWC (boundary only), drop odd trailing row/col like PyTorch.
    x = jnp.transpose(x_nchw, (0, 2, 3, 1)).astype(jnp.float32)
    x = x[:, :he, :we, :]
    # Free reshape: pack horizontally-adjacent pixel pairs into the lane dim.
    xp = x.reshape(n, he, wout, 2 * cin)

    # Fold BN to scale/shift; duplicate for the packed pixel pair.
    s, b = _fold_bn(params["g1"], params["be1"], params["m1"], params["v1"])
    s2 = jnp.concatenate([s, s]).reshape(1, 2 * cin)
    b2 = jnp.concatenate([b, b]).reshape(1, 2 * cin)
    # Stacked weight does conv + horizontal pool-sum; fold the 0.25 average.
    w_stack = 0.25 * jnp.concatenate([w1, w1], axis=0)  # (2*Cin, Cout)

    tro = _pick_row_tile(hout, wout, cin, cout)
    grid = (n, pl.cdiv(hout, tro))

    y = pl.pallas_call(
        _transition_kernel,
        out_shape=jax.ShapeDtypeStruct((n, hout, wout, cout), jnp.float32),
        grid=grid,
        in_specs=[
            pl.BlockSpec((1, 2 * tro, wout, 2 * cin), lambda bi, ri: (bi, ri, 0, 0)),
            pl.BlockSpec((1, 2 * cin), lambda bi, ri: (0, 0)),
            pl.BlockSpec((1, 2 * cin), lambda bi, ri: (0, 0)),
            pl.BlockSpec((2 * cin, cout), lambda bi, ri: (0, 0)),
        ],
        out_specs=pl.BlockSpec((1, tro, wout, cout), lambda bi, ri: (bi, ri, 0, 0)),
        compiler_params=pltpu.CompilerParams(
            dimension_semantics=("parallel", "parallel"),
            vmem_limit_bytes=32 * 1024 * 1024),
    )(xp, s2, b2, w_stack)

    # NHWC -> NCHW at the boundary.
    return jnp.transpose(y, (0, 3, 1, 2))


# ----------------------------------------------------------------------------
# Pure-JAX reference for validation (PyTorch op order: conv then avg-pool)
# ----------------------------------------------------------------------------
def transition_reference(params, x_nchw):
    x = jnp.transpose(x_nchw, (0, 2, 3, 1)).astype(jnp.float32)
    s, b = _fold_bn(params["g1"], params["be1"], params["m1"], params["v1"])
    hact = jnp.maximum(x * s + b, 0.0)
    t = jnp.einsum("nhwc,cd->nhwd", hact, params["w1"])
    n, hh, ww, cout = t.shape
    hout, wout = hh // 2, ww // 2
    t = t[:, :2 * hout, :2 * wout, :]
    p = t.reshape(n, hout, 2, wout, 2, cout).mean(axis=(2, 4))
    return jnp.transpose(p, (0, 3, 1, 2))


if __name__ == "__main__":
    key = jax.random.PRNGKey(0)
    k_param, k_x = jax.random.split(key)

    N, nChannels, H, W = 2, 4, 16, 16
    nOutChannels = 2

    params = init_transition_params(k_param, nChannels, nOutChannels)
    x = jax.random.normal(k_x, (N, nChannels, H, W), jnp.float32)

    out = transition_forward(params, x)
    out = jax.block_until_ready(out)

    ref = transition_reference(params, x)
    assert out.shape == (N, nOutChannels, H // 2, W // 2), out.shape
    max_err = float(jnp.max(jnp.abs(out - ref)))
    assert jnp.allclose(out, ref, atol=1e-4, rtol=1e-4), max_err

    print("KERNEL_OK")
</pallas_src>

<mosaic_0001>
module attributes {stable_mosaic.version = 11 : i64} {
  func.func @_transition_kernel(%arg0: i32, %arg1: i32, %arg2: memref<1x16x8x8xf32, #tpu.memory_space<vmem>>, %arg3: memref<1x8xf32, #tpu.memory_space<vmem>>, %arg4: memref<1x8xf32, #tpu.memory_space<vmem>>, %arg5: memref<8x2xf32, #tpu.memory_space<vmem>>, %arg6: memref<1x8x8x2xf32, #tpu.memory_space<vmem>>) attributes {dimension_semantics = [#tpu.dimension_semantics<parallel>, #tpu.dimension_semantics<parallel>], iteration_bounds = array<i64: 2, 1>, scalar_prefetch = 0 : i64, scratch_operands = 0 : i64, tpu.core_type = #tpu.core_type<tc>, window_params = [{transform_indices = @transform_0, window_bounds = array<i64: 1, 16, 8, 8>}, {pipeline_mode = #tpu.pipeline_mode<synchronous>, transform_indices = @transform_1, window_bounds = array<i64: 1, 8>}, {pipeline_mode = #tpu.pipeline_mode<synchronous>, transform_indices = @transform_2, window_bounds = array<i64: 1, 8>}, {pipeline_mode = #tpu.pipeline_mode<synchronous>, transform_indices = @transform_3, window_bounds = array<i64: 8, 2>}, {transform_indices = @transform_4, window_bounds = array<i64: 1, 8, 8, 2>}]} {
    %c0 = arith.constant 0 : index
    %c0_0 = arith.constant 0 : index
    %c0_1 = arith.constant 0 : index
    %c0_2 = arith.constant 0 : index
    %0 = vector.load %arg2[%c0, %c0_0, %c0_1, %c0_2] : memref<1x16x8x8xf32, #tpu.memory_space<vmem>>, vector<1x16x8x8xf32>
    %1 = vector.shape_cast %0 : vector<1x16x8x8xf32> to vector<16x8x8xf32>
    %c0_3 = arith.constant 0 : index
    %c0_4 = arith.constant 0 : index
    %2 = vector.load %arg3[%c0_3, %c0_4] : memref<1x8xf32, #tpu.memory_space<vmem>>, vector<1x8xf32>
    %3 = vector.shape_cast %2 : vector<1x8xf32> to vector<1x1x8xf32>
    %4 = vector.broadcast %3 : vector<1x1x8xf32> to vector<16x8x8xf32>
    %5 = arith.mulf %1, %4 : vector<16x8x8xf32>
    %c0_5 = arith.constant 0 : index
    %c0_6 = arith.constant 0 : index
    %6 = vector.load %arg4[%c0_5, %c0_6] : memref<1x8xf32, #tpu.memory_space<vmem>>, vector<1x8xf32>
    %7 = vector.shape_cast %6 : vector<1x8xf32> to vector<1x1x8xf32>
    %8 = vector.broadcast %7 : vector<1x1x8xf32> to vector<16x8x8xf32>
    %9 = arith.addf %5, %8 : vector<16x8x8xf32>
    %cst = arith.constant 0.000000e+00 : f32
    %10 = vector.broadcast %cst : f32 to vector<16x8x8xf32>
    %11 = arith.maximumf %9, %10 : vector<16x8x8xf32>
    %12 = vector.shape_cast %11 : vector<16x8x8xf32> to vector<8x2x8x8xf32>
    %13 = vector.extract_strided_slice %12 {offsets = [0, 0, 0, 0], sizes = [8, 1, 8, 8], strides = [1, 1, 1, 1]} : vector<8x2x8x8xf32> to vector<8x1x8x8xf32>
    %14 = vector.shape_cast %13 : vector<8x1x8x8xf32> to vector<8x8x8xf32>
    %15 = vector.extract_strided_slice %12 {offsets = [0, 1, 0, 0], sizes = [8, 1, 8, 8], strides = [1, 1, 1, 1]} : vector<8x2x8x8xf32> to vector<8x1x8x8xf32>
    %16 = vector.shape_cast %15 : vector<8x1x8x8xf32> to vector<8x8x8xf32>
    %17 = arith.addf %14, %16 : vector<8x8x8xf32>
    %c0_7 = arith.constant 0 : index
    %c0_8 = arith.constant 0 : index
    %18 = vector.load %arg5[%c0_7, %c0_8] : memref<8x2xf32, #tpu.memory_space<vmem>>, vector<8x2xf32>
    %cst_9 = arith.constant dense<0.000000e+00> : vector<8x8x2xf32>
    %19 = tpu.matmul %17, %18, %cst_9 {dimension_numbers = #tpu.dot_dimension_numbers<[2], [0], [0, 1], [1], [0, 0, 0, 1, 1, 1], [], []>} : vector<8x8x8xf32>, vector<8x2xf32>, vector<8x8x2xf32> -> vector<8x8x2xf32>
    %c0_10 = arith.constant 0 : index
    %c0_11 = arith.constant 0 : index
    %c0_12 = arith.constant 0 : index
    %c0_13 = arith.constant 0 : index
    %20 = vector.load %arg6[%c0_10, %c0_11, %c0_12, %c0_13] : memref<1x8x8x2xf32, #tpu.memory_space<vmem>>, vector<1x8x8x2xf32>
    %21 = vector.shape_cast %20 : vector<1x8x8x2xf32> to vector<8x8x2xf32>
    %22 = vector.shape_cast %19 : vector<8x8x2xf32> to vector<1x8x8x2xf32>
    tpu.vector_store %arg6[%c0_10, %c0_11, %c0_12, %c0_13], %22 {strides = array<i32>} : memref<1x8x8x2xf32, #tpu.memory_space<vmem>>, vector<1x8x8x2xf32>,
    return
  }
  func.func @transform_0(%arg0: i32, %arg1: i32) -> (i32, i32, i32, i32) {
    %c0_i32 = arith.constant 0 : i32
    %c0_i32_0 = arith.constant 0 : i32
    %c0_i32_1 = arith.constant 0 : i32
    return %arg0, %arg1, %c0_i32, %c0_i32_0 : i32, i32, i32, i32
  }
  func.func @transform_1(%arg0: i32, %arg1: i32) -> (i32, i32) {
    %c0_i32 = arith.constant 0 : i32
    %c0_i32_0 = arith.constant 0 : i32
    %c0_i32_1 = arith.constant 0 : i32
    return %c0_i32, %c0_i32_0 : i32, i32
  }
  func.func @transform_2(%arg0: i32, %arg1: i32) -> (i32, i32) {
    %c0_i32 = arith.constant 0 : i32
    %c0_i32_0 = arith.constant 0 : i32
    %c0_i32_1 = arith.constant 0 : i32
    return %c0_i32, %c0_i32_0 : i32, i32
  }
  func.func @transform_3(%arg0: i32, %arg1: i32) -> (i32, i32) {
    %c0_i32 = arith.constant 0 : i32
    %c0_i32_0 = arith.constant 0 : i32
    %c0_i32_1 = arith.constant 0 : i32
    return %c0_i32, %c0_i32_0 : i32, i32
  }
  func.func @transform_4(%arg0: i32, %arg1: i32) -> (i32, i32, i32, i32) {
    %c0_i32 = arith.constant 0 : i32
    %c0_i32_0 = arith.constant 0 : i32
    %c0_i32_1 = arith.constant 0 : i32
    return %arg0, %arg1, %c0_i32, %c0_i32_0 : i32, i32, i32, i32
  }
}

</mosaic_0001>

<bundles_post_ra>
// kernel: transition_forward.1
= control target key start
LH: loop header
LB: loop body
LE: loop exit
PB: predicated region body
PF: predicated region fallthrough
CT: control target
= control target key end

     0   :  { %s671_s15 = smov 0   ;;  %s673_s16 = smov 0   ;;  %s787_s0 = inlined_call_operand.vmem [shape: f32[2,16,8,8], index: 0, kind: input, shape index: {}]   ;;  %s788_s1 = inlined_call_operand.vmem [shape: f32[1,8], index: 1, kind: input, shape index: {}]   ;;  %s789_s2 = inlined_call_operand.vmem [shape: f32[1,8], index: 2, kind: input, shape index: {}]   ;;  %s790_s3 = inlined_call_operand.vmem [shape: f32[8,2], index: 3, kind: input, shape index: {}]   ;;  %s791_s4 = inlined_call_operand.vmem [shape: f32[2,8,8,2], index: 4, kind: output, shape index: {}]  }
   0x1   :  { %s675_s17 = smov 0  }
   0x2 LB: > { %s26_s18 = sadd.s32 1, %s640_s16  ;;  %p554_p0 = scmp.ge.s32.totalorder %s644_s17, 1  ;;  %s644_s17 = sphi %s675_s17, %s14_s17   ;;  %s640_s16 = sphi %s673_s16, %s793_s16   ;;  %s636_s15 = sphi %s671_s15, %s792_s15  }
   0x3   : > { %p28_p1 = scmp.ge.s32.totalorder %s26_s18, 2  ;;  %p183_p2 = scmp.lt.s32.totalorder %s644_s17, 3 }
   0x5   : > { %s795_s18 = smov (%p28_p1, %s26_s18), 0  ;;  %p184_p3 = pnand %p554_p0, %p183_p2 }
   0x6   : > { %p218_p4 = scmp.lt.s32.totalorder (!%p184_p3), %s636_s15, 1 }
   0x7   : > { %187 = sbr.rel (%p184_p3) target bundleno = 231 (0xe7), region = 36 }
   0xc   : > { %v323_v0 = vld [vmem:[%s790_s3] sm:$0xff]  ;;  %s797_s15 = smov (!%p218_p4, %s636_s15), 1  ;;  %vm324_vm0 = vcmask 64512   ;;  %vm454_vm1 = vcmask 15360  }
   0xd   : > { %582 = vmatprep.subr.mxu0 %v323_v0  ;;  %596 = vmatprep.subr.mxu1 %v323_v0  ;;  %s571_s21 = sshll.u32 %s797_s15, 7  ;;  %v698_v1 = vld [vmem:[%s788_s1] ss:$0 sm:$0xff]  ;;  %s572_s29 = sshll.u32 %s797_s15, 6 }
   0xe   : > { %583 = vmatpush3.msra.mxu0 %v323_v0  ;;  %597 = vmatpush3.msra.mxu1 %v323_v0  ;;  %s703_s26 = scalar_lea.vmem %s787_s0, %s571_s21  ;;  %v708_v2 = vld [vmem:[%s789_s2] ss:$0 sm:$0xff]  ;;  %s235_s6 = scalar_lea.vmem %s791_s4, %s572_s29 }
   0xf   : > { %v237_v3 = vld [vmem:[%s703_s26] sm:$0xff]  ;;  %v238_v4 = vld [vmem:[%s703_s26 + $0x8] sm:$0xff]  ;;  %v239_v10 = vld [vmem:[%s703_s26 + $0x10] sm:$0xff] }
  0x10   : > { %v245_v5 = vld [vmem:[%s703_s26 + $0x40] sm:$0xff]  ;;  %v260_v6 = vmul.f32 %v698_v1, %v237_v3  ;;  %v261_v7 = vmul.f32 %v698_v1, %v238_v4  ;;  %v246_v8 = vld [vmem:[%s703_s26 + $0x48] sm:$0xff]  ;;  %v240_v11 = vld [vmem:[%s703_s26 + $0x18] sm:$0xff]  ;;  %v262_v13 = vmul.f32 %v698_v1, %v239_v10 }
  0x11   : > { %v268_v9 = vmul.f32 %v698_v1, %v245_v5  ;;  %v269_v12 = vmul.f32 %v698_v1, %v246_v8  ;;  %v263_v14 = vmul.f32 %v698_v1, %v240_v11  ;;  %v247_v15 = vld [vmem:[%s703_s26 + $0x50] sm:$0xff]  ;;  %v248_v16 = vld [vmem:[%s703_s26 + $0x58] sm:$0xff]  ;;  %v241_v25 = vld [vmem:[%s703_s26 + $0x20] sm:$0xff] }
  0x12   : > { %v283_v17 = vadd.f32 %v708_v2, %v260_v6  ;;  %v284_v18 = vadd.f32 %v708_v2, %v261_v7  ;;  %v270_v20 = vmul.f32 %v698_v1, %v247_v15  ;;  %v285_v22 = vadd.f32 %v708_v2, %v262_v13  ;;  %v242_v26 = vld [vmem:[%s703_s26 + $0x28] sm:$0xff]  ;;  %v249_v31 = vld [vmem:[%s703_s26 + $0x60] sm:$0xff]  ;;  %v243_v37 = vld [vmem:[%s703_s26 + $0x30] sm:$0xff] }
  0x13   : > { %v291_v19 = vadd.f32 %v708_v2, %v268_v9  ;;  %v292_v21 = vadd.f32 %v708_v2, %v269_v12  ;;  %v286_v23 = vadd.f32 %v708_v2, %v263_v14  ;;  %v271_v24 = vmul.f32 %v698_v1, %v248_v16  ;;  %v250_v36 = vld [vmem:[%s703_s26 + $0x68] sm:$0xff]  ;;  %v244_v42 = vld [vmem:[%s703_s26 + $0x38] sm:$0xff]  ;;  %v251_v51 = vld [vmem:[%s703_s26 + $0x70] sm:$0xff] }
  0x14   : > { %v299_v27 = vmax.f32 %v283_v17, 0.0  ;;  %v300_v28 = vmax.f32 %v284_v18, 0.0  ;;  %v293_v30 = vadd.f32 %v708_v2, %v270_v20  ;;  %v301_v33 = vmax.f32 %v285_v22, 0.0  ;;  %v252_v52 = vld [vmem:[%s703_s26 + $0x78] sm:$0xff] }
  0x15   : > { %v307_v29 = vmax.f32 %v291_v19, 0.0  ;;  %v308_v32 = vmax.f32 %v292_v21, 0.0  ;;  %v302_v34 = vmax.f32 %v286_v23, 0.0  ;;  %v294_v35 = vadd.f32 %v708_v2, %v271_v24 }
  0x16   : > { %v315_v38 = vadd.f32 %v300_v28, %v299_v27  ;;  %v309_v39 = vmax.f32 %v293_v30, 0.0  ;;  %v264_v40 = vmul.f32 %v698_v1, %v241_v25  ;;  %v265_v41 = vmul.f32 %v698_v1, %v242_v26 }
  0x17   : > { %v319_v43 = vadd.f32 %v308_v32, %v307_v29  ;;  %v316_v44 = vadd.f32 %v302_v34, %v301_v33  ;;  %v310_v45 = vmax.f32 %v294_v35, 0.0  ;;  %v272_v46 = vmul.f32 %v698_v1, %v249_v31 }
  0x18   : > { %584 = vmatprep.mubr.msk.f32.mxu0 %vm324_vm0, %v315_v38  ;;  %v287_v47 = vadd.f32 %v708_v2, %v264_v40  ;;  %v288_v48 = vadd.f32 %v708_v2, %v265_v41  ;;  %v273_v49 = vmul.f32 %v698_v1, %v250_v36  ;;  %v266_v50 = vmul.f32 %v698_v1, %v243_v37 }
  0x19   : > { %590 = vmatprep.mubr.msk.f32.mxu1 %vm324_vm0, %v319_v43  ;;  %585 = vmatmul.mubr.msk.f32.vlgmr.msra.gmra.mxu0 %vm324_vm0, %v316_v44  ;;  %v320_v53 = vadd.f32 %v310_v45, %v309_v39  ;;  %v295_v54 = vadd.f32 %v708_v2, %v272_v46  ;;  %v267_v55 = vmul.f32 %v698_v1, %v244_v42 }
  0x1a   : > { %v303_v56 = vmax.f32 %v287_v47, 0.0  ;;  %v304_v57 = vmax.f32 %v288_v48, 0.0  ;;  %v296_v58 = vadd.f32 %v708_v2, %v273_v49  ;;  %v289_v59 = vadd.f32 %v708_v2, %v266_v50 }
  0x1b   : > { %591 = vmatmul.mubr.msk.f32.vlgmr.msra.gmra.mxu1 %vm324_vm0, %v320_v53  ;;  %v311_v60 = vmax.f32 %v295_v54, 0.0  ;;  %v290_v61 = vadd.f32 %v708_v2, %v267_v55  ;;  %v274_v62 = vmul.f32 %v698_v1, %v251_v51  ;;  %v275_v63 = vmul.f32 %v698_v1, %v252_v52 }
  0x1c   : > { %v317_v0 = vadd.f32 %v304_v57, %v303_v56  ;;  %v312_v3 = vmax.f32 %v296_v58, 0.0  ;;  %v305_v4 = vmax.f32 %v289_v59, 0.0 }
  0x1d   : > { %v306_v5 = vmax.f32 %v290_v61, 0.0  ;;  %v297_v6 = vadd.f32 %v708_v2, %v274_v62  ;;  %v298_v7 = vadd.f32 %v708_v2, %v275_v63 }
  0x1e   : > { %587 = vmatprep.mubr.msk.f32.mxu0 %vm324_vm0, %v317_v0  ;;  %v321_v8 = vadd.f32 %v312_v3, %v311_v60 }
  0x1f   : > { %v318_v9 = vadd.f32 %v306_v5, %v305_v4  ;;  %v313_v10 = vmax.f32 %v297_v6, 0.0  ;;  %v314_v11 = vmax.f32 %v298_v7, 0.0 }
  0x20   : > { %593 = vmatprep.mubr.msk.f32.mxu1 %vm324_vm0, %v321_v8 }
  0x21   : > { %588 = vmatmul.mubr.msk.f32.gmra.mxu0 %vm324_vm0, %v318_v9  ;;  %v322_v1 = vadd.f32 %v314_v11, %v313_v10 }
  0x23   : > { %594 = vmatmul.mubr.msk.f32.gmra.mxu1 %vm324_vm0, %v322_v1 }
  0xd9   : > { %v586_v2 = vpop.f32.mrf.mxu0 }
  0xda   : > { %456 = vst.msk [vmem:[%s235_s6 + $0x8] sm:$0xff] %vm454_vm1, %v586_v2 }
  0xdb   : > { %v592_v12 = vpop.f32.mrf.mxu1  ;;  %v415_v13 = vpop.f32.mrf.mxu0 }
  0xdc   : > { %460 = vst.msk [vmem:[%s235_s6 + $0x28] sm:$0xff] %vm454_vm1, %v592_v12  ;;  %455 = vst.msk [vmem:[%s235_s6] sm:$0xff] %vm454_vm1, %v415_v13 }
  0xdd   : > { %v435_v14 = vpop.f32.mrf.mxu1 }
  0xde   : > { %459 = vst.msk [vmem:[%s235_s6 + $0x20] sm:$0xff] %vm454_vm1, %v435_v14 }
  0xe1   : > { %v589_v15 = vpop.f32.mrf.mxu0 }
  0xe2   : > { %458 = vst.msk [vmem:[%s235_s6 + $0x18] sm:$0xff] %vm454_vm1, %v589_v15 }
  0xe3   : > { %v595_v16 = vpop.f32.mrf.mxu1  ;;  %v425_v17 = vpop.f32.mrf.mxu0 }
  0xe4   : > { %462 = vst.msk [vmem:[%s235_s6 + $0x38] sm:$0xff] %vm454_vm1, %v595_v16  ;;  %457 = vst.msk [vmem:[%s235_s6 + $0x10] sm:$0xff] %vm454_vm1, %v425_v17 }
  0xe5   : > { %v445_v18 = vpop.f32.mrf.mxu1 }
  0xe6   : > { %461 = vst.msk [vmem:[%s235_s6 + $0x30] sm:$0xff] %vm454_vm1, %v445_v18 }
  0xe7 PF: > { %s14_s17 = sadd.s32 1, %s644_s17   ;;  %s792_s15 = smov %s640_s16 }
  0xe8   : > { %p11_p5 = scmp.ge.s32.totalorder %s14_s17, 4   ;;  %s793_s16 = smov %s795_s18 }
  0xea   :  { %13 = sbr.rel (!%p11_p5) target bundleno = 2 (0x2), region = 66 }

</bundles_post_ra>
